<compile_context>
chip_gen: v6e
topology: v6e:2x2x1
jax: 0.10.0
libtpu: 0.0.40
codegen_flags: <defaults>
</compile_context>

<pallas_src>
import jax
import jax.numpy as jnp
from jax import lax
from jax.experimental import pallas as pl
from jax.experimental.pallas import tpu as pltpu

# ---- problem sizes (small, synthetic) --------------------------------------
B, CIN, H, W = 2, 4, 16, 16      # batch, in_channels, spatial
COUT = 10                        # channels per branch (module hard-codes 10)
K5 = 5                           # largest kernel; 1x1/3x3 embedded in its footprint
KK = K5 * K5                     # 25 taps
PATCH_K = CIN * KK               # 100  (im2col contraction dim)
NOUT = 3 * COUT                  # 30   (concatenated output channels)


# ---- Pallas kernel ----------------------------------------------------------
def inception_kernel(p_ref, w_ref, b_ref, o_ref):
    """One batch element per grid step: one fused MXU matmul, one store.

    p_ref : (1, PATCH_K, H*W)   im2col patches^T for this batch element
    w_ref : (NOUT, PATCH_K)     fused weight (1x1 center / 3x3 inner / 5x5, concat)
    b_ref : (NOUT, 1)           fused bias
    o_ref : (1, NOUT, H*W)      lane-dense output (free reshape to NCHW outside)
    """
    acc = jnp.dot(w_ref[...], p_ref[0], preferred_element_type=jnp.float32)
    o_ref[0] = acc + b_ref[...]          # single (30, 256) unmasked store


# ---- wrapper ----------------------------------------------------------------
@jax.jit
def simplified_inception(x_nchw, params):
    """x_nchw: (B, CIN, H, W) float32 -> (B, 3*COUT, H, W) float32 (NCHW)."""
    w1, b1, w3, b3, w5, b5 = params      # PyTorch layouts: (COUT, CIN, k, k), (COUT,)
    b_, c_, h_, w_ = x_nchw.shape
    hw = h_ * w_

    # Single-op im2col: (B, CIN*25, H, W); feature ordering is (c, kh, kw)
    # (input channel slowest), matching an OIHW weight reshaped to (O, C*KH*KW).
    patches = lax.conv_general_dilated_patches(
        x_nchw,
        filter_shape=(K5, K5),
        window_strides=(1, 1),
        padding=((K5 // 2, K5 // 2), (K5 // 2, K5 // 2)),
        dimension_numbers=("NCHW", "OIHW", "NCHW"),
    ).reshape(b_, c_ * KK, hw)

    # Fuse weights/biases once: embed 1x1 at the center tap and 3x3 as the inner
    # 3x3 of the 5x5 footprint, concat over output channels, flatten K dim.
    w1p = jnp.pad(w1, ((0, 0), (0, 0), (2, 2), (2, 2)))
    w3p = jnp.pad(w3, ((0, 0), (0, 0), (1, 1), (1, 1)))
    w_fused = jnp.concatenate([w1p, w3p, w5], axis=0).reshape(NOUT, c_ * KK)
    b_fused = jnp.concatenate([b1, b3, b5], axis=0).reshape(NOUT, 1)

    out = pl.pallas_call(
        inception_kernel,
        out_shape=jax.ShapeDtypeStruct((b_, NOUT, hw), jnp.float32),
        grid_spec=pltpu.PrefetchScalarGridSpec(
            num_scalar_prefetch=0,
            grid=(b_,),
            in_specs=[
                pl.BlockSpec((1, c_ * KK, hw), lambda b: (b, 0, 0)),
                pl.BlockSpec((NOUT, c_ * KK), lambda b: (0, 0)),   # resident
                pl.BlockSpec((NOUT, 1), lambda b: (0, 0)),         # resident
            ],
            out_specs=pl.BlockSpec((1, NOUT, hw), lambda b: (b, 0, 0)),
        ),
        compiler_params=pltpu.CompilerParams(
            dimension_semantics=("parallel",),   # 2 TCs on v7x take one step each
        ),
    )(patches, w_fused, b_fused)

    # (B, 30, 256) -> (B, 30, 16, 16): contiguous reshape, no transpose.
    return out.reshape(b_, NOUT, h_, w_)


def init_params(key):
    """Deterministic synthetic init in PyTorch layouts: (COUT, CIN, k, k) / (COUT,)."""
    ks = jax.random.split(key, 6)
    w1 = jax.random.normal(ks[0], (COUT, CIN, 1, 1), jnp.float32) * 0.1
    b1 = jax.random.normal(ks[1], (COUT,), jnp.float32) * 0.1
    w3 = jax.random.normal(ks[2], (COUT, CIN, 3, 3), jnp.float32) * 0.1
    b3 = jax.random.normal(ks[3], (COUT,), jnp.float32) * 0.1
    w5 = jax.random.normal(ks[4], (COUT, CIN, 5, 5), jnp.float32) * 0.1
    b5 = jax.random.normal(ks[5], (COUT,), jnp.float32) * 0.1
    return (w1, b1, w3, b3, w5, b5)


def reference(x_nchw, params):
    """Pure-JAX reference using lax.conv (matches PyTorch conv2d semantics)."""
    w1, b1, w3, b3, w5, b5 = params
    dn = ("NCHW", "OIHW", "NCHW")

    def conv(w, b):
        y = lax.conv_general_dilated(x_nchw, w, window_strides=(1, 1),
                                     padding="SAME", dimension_numbers=dn)
        return y + b.reshape(1, -1, 1, 1)

    return jnp.concatenate([conv(w1, b1), conv(w3, b3), conv(w5, b5)], axis=1)


if __name__ == "__main__":
    key = jax.random.PRNGKey(0)
    kx, kp = jax.random.split(key)
    x = jax.random.normal(kx, (B, CIN, H, W), jnp.float32)
    params = init_params(kp)

    out = simplified_inception(x, params)
    out = jax.block_until_ready(out)

    ref = reference(x, params)
    assert out.shape == (B, 3 * COUT, H, W), out.shape
    assert jnp.allclose(out, ref, atol=1e-4, rtol=1e-4), "mismatch vs lax.conv reference"

    print("KERNEL_OK")
</pallas_src>

<mosaic_0001>
module attributes {stable_mosaic.version = 11 : i64} {
  func.func @inception_kernel(%arg0: i32, %arg1: memref<1x100x256xf32, #tpu.memory_space<vmem>>, %arg2: memref<30x100xf32, #tpu.memory_space<vmem>>, %arg3: memref<30x1xf32, #tpu.memory_space<vmem>>, %arg4: memref<1x30x256xf32, #tpu.memory_space<vmem>>) attributes {dimension_semantics = [#tpu.dimension_semantics<parallel>], iteration_bounds = array<i64: 2>, scalar_prefetch = 0 : i64, scratch_operands = 0 : i64, tpu.core_type = #tpu.core_type<tc>, window_params = [{transform_indices = @transform_0, window_bounds = array<i64: 1, 100, 256>}, {pipeline_mode = #tpu.pipeline_mode<synchronous>, transform_indices = @transform_1, window_bounds = array<i64: 30, 100>}, {pipeline_mode = #tpu.pipeline_mode<synchronous>, transform_indices = @transform_2, window_bounds = array<i64: 30, 1>}, {transform_indices = @transform_3, window_bounds = array<i64: 1, 30, 256>}]} {
    %c0 = arith.constant 0 : index
    %c0_0 = arith.constant 0 : index
    %0 = vector.load %arg2[%c0, %c0_0] : memref<30x100xf32, #tpu.memory_space<vmem>>, vector<30x100xf32>
    %c0_1 = arith.constant 0 : index
    %c0_2 = arith.constant 0 : index
    %c0_3 = arith.constant 0 : index
    %1 = vector.load %arg1[%c0_1, %c0_2, %c0_3] : memref<1x100x256xf32, #tpu.memory_space<vmem>>, vector<1x100x256xf32>
    %2 = vector.shape_cast %1 : vector<1x100x256xf32> to vector<100x256xf32>
    %cst = arith.constant dense<0.000000e+00> : vector<30x256xf32>
    %3 = tpu.matmul %0, %2, %cst {dimension_numbers = #tpu.dot_dimension_numbers<[1], [0], [0], [1], [0, 0, 1, 1], [], []>} : vector<30x100xf32>, vector<100x256xf32>, vector<30x256xf32> -> vector<30x256xf32>
    %c0_4 = arith.constant 0 : index
    %c0_5 = arith.constant 0 : index
    %4 = vector.load %arg3[%c0_4, %c0_5] : memref<30x1xf32, #tpu.memory_space<vmem>>, vector<30x1xf32>
    %5 = vector.broadcast %4 : vector<30x1xf32> to vector<30x256xf32>
    %6 = arith.addf %3, %5 : vector<30x256xf32>
    %c0_6 = arith.constant 0 : index
    %c0_7 = arith.constant 0 : index
    %c0_8 = arith.constant 0 : index
    %7 = vector.load %arg4[%c0_6, %c0_7, %c0_8] : memref<1x30x256xf32, #tpu.memory_space<vmem>>, vector<1x30x256xf32>
    %8 = vector.shape_cast %7 : vector<1x30x256xf32> to vector<30x256xf32>
    %9 = vector.shape_cast %6 : vector<30x256xf32> to vector<1x30x256xf32>
    tpu.vector_store %arg4[%c0_6, %c0_7, %c0_8], %9 {strides = array<i32>} : memref<1x30x256xf32, #tpu.memory_space<vmem>>, vector<1x30x256xf32>,
    return
  }
  func.func @transform_0(%arg0: i32) -> (i32, i32, i32) {
    %c0_i32 = arith.constant 0 : i32
    %c0_i32_0 = arith.constant 0 : i32
    %c0_i32_1 = arith.constant 0 : i32
    return %arg0, %c0_i32, %c0_i32_0 : i32, i32, i32
  }
  func.func @transform_1(%arg0: i32) -> (i32, i32) {
    %c0_i32 = arith.constant 0 : i32
    %c0_i32_0 = arith.constant 0 : i32
    %c0_i32_1 = arith.constant 0 : i32
    return %c0_i32, %c0_i32_0 : i32, i32
  }
  func.func @transform_2(%arg0: i32) -> (i32, i32) {
    %c0_i32 = arith.constant 0 : i32
    %c0_i32_0 = arith.constant 0 : i32
    %c0_i32_1 = arith.constant 0 : i32
    return %c0_i32, %c0_i32_0 : i32, i32
  }
  func.func @transform_3(%arg0: i32) -> (i32, i32, i32) {
    %c0_i32 = arith.constant 0 : i32
    %c0_i32_0 = arith.constant 0 : i32
    %c0_i32_1 = arith.constant 0 : i32
    return %arg0, %c0_i32, %c0_i32_0 : i32, i32, i32
  }
}

</mosaic_0001>

<bundles_post_ra>
// kernel: simplified_inception.1
= control target key start
LH: loop header
LB: loop body
LE: loop exit
PB: predicated region body
PF: predicated region fallthrough
CT: control target
= control target key end

     0   :  { %s483_s12 = smov 0   ;;  %s560_s0 = inlined_call_operand.vmem [shape: f32[2,100,256], index: 0, kind: input, shape index: {}]   ;;  %s561_s1 = inlined_call_operand.vmem [shape: f32[30,100], index: 1, kind: input, shape index: {}]   ;;  %s562_s2 = inlined_call_operand.vmem [shape: f32[30,1], index: 2, kind: input, shape index: {}]   ;;  %s563_s3 = inlined_call_operand.vmem [shape: f32[2,30,256], index: 3, kind: output, shape index: {}]  }
   0x1 LB: > { %s397_s13 = sadd.s32 4294967295, %s459_s12   ;;  %p401_p0 = scmp.ge.s32.totalorder %s459_s12, 1  ;;  %s459_s12 = sphi %s483_s12, %s13_s12  }
   0x2   : > { %p137_p1 = scmp.lt.s32.totalorder %s459_s12, 3 }
   0x4   : > { %p138_p2 = pnand %p401_p0, %p137_p1 }
   0x5   : > { %p161_p3 = scmp.lt.s32.totalorder (!%p138_p2), %s397_s13, 1 }
   0x6   : > { %141 = sbr.rel (%p138_p2) target bundleno = 245 (0xf5), region = 32 }
   0xb   : > { %v461_v0 = vmov 0.0   ;;  %v203_v1 = vld [vmem:[%s562_s2 + $0x10] sm:$0xff]  ;;  %s565_s13 = smov (!%p161_p3, %s397_s13), 1  ;;  %v462_v2 = vmov 0   ;;  %v201_v3 = vld [vmem:[%s562_s2] sm:$0xff]  ;;  %v202_v5 = vld [vmem:[%s562_s2 + $0x8] sm:$0xff] }
   0xc   : > { %309 = vmatprep.mubr.f32.mxu0 %v461_v0  ;;  %321 = vmatprep.mubr.f32.mxu1 %v461_v0  ;;  %s440_s18 = smul.u32 208, %s565_s13  ;;  %v204_v4 = vld [vmem:[%s562_s2 + $0x18] sm:$0x3f]  ;;  %vm238_vm0 = vcmask 1043456   ;;  %v171_v32 = vld [vmem:[%s561_s1] sm:$0xff]  ;;  %vm225_vm1 = vcmask 818176  }
   0xd   : > { %452 = vset.pattern.permute.xlu1 %v462_v2  ;;  %451 = vset.pattern.permute.xlu0 %v462_v2  ;;  %v173_v33 = vld [vmem:[%s561_s1 + $0x10] sm:$0xff]  ;;  %v172_v34 = vld [vmem:[%s561_s1 + $0x8] sm:$0xff]  ;;  %v174_v35 = vld [vmem:[%s561_s1 + $0x18] sm:$0x3f]  ;;  %s413_s7 = sshll.u32 %s565_s13, 6 }
   0xe   : > { %217 = vperm.xlu1 %452, %v203_v1   ;;  %207 = vperm.xlu0 %451, %v201_v3   ;;  %s511_s25 = scalar_lea.vmem %s560_s0, %s440_s18  ;;  %s170_s10 = scalar_lea.vmem %s563_s3, %s413_s7 }
   0xf   : > { %v200_v6 = vld [vmem:[%s511_s25 + $0xc8] sm:$0xf]  ;;  %v199_v7 = vld [vmem:[%s511_s25 + $0xc0] sm:$0xf]  ;;  %v198_v8 = vld [vmem:[%s511_s25 + $0xb8] sm:$0xff] }
  0x10   : > { %405 = vmatprep.subr.msk.mxu0 %vm238_vm0, %v200_v6  ;;  %414 = vmatprep.subr.msk.mxu1 %vm238_vm0, %v200_v6  ;;  %v197_v9 = vld [vmem:[%s511_s25 + $0xb0] sm:$0xff]  ;;  %v196_v10 = vld [vmem:[%s511_s25 + $0xa8] sm:$0xff]  ;;  %v195_v11 = vld [vmem:[%s511_s25 + $0xa0] sm:$0xff] }
  0x11   : > { %406 = vmatpush1.msk.msra.mxu0 %vm238_vm0, %v199_v7  ;;  %427 = vmatpush1.msk.msra.mxu1 %vm238_vm0, %v199_v7  ;;  %v194_v12 = vld [vmem:[%s511_s25 + $0x98] sm:$0xff]  ;;  %v193_v13 = vld [vmem:[%s511_s25 + $0x90] sm:$0xff]  ;;  %v192_v14 = vld [vmem:[%s511_s25 + $0x88] sm:$0xff] }
  0x12   : > { %222 = vperm.xlu1 %452, %v204_v4   ;;  %212 = vperm.xlu0 %451, %v202_v5   ;;  %v191_v15 = vld [vmem:[%s511_s25 + $0x80] sm:$0xff]  ;;  %v190_v16 = vld [vmem:[%s511_s25 + $0x78] sm:$0xff]  ;;  %v189_v17 = vld [vmem:[%s511_s25 + $0x70] sm:$0xff] }
  0x13   : > { %253 = vmatprep.subr.mxu0 %v198_v8  ;;  %415 = vmatprep.subr.mxu1 %v198_v8  ;;  %v188_v18 = vld [vmem:[%s511_s25 + $0x68] sm:$0xff]  ;;  %v187_v19 = vld [vmem:[%s511_s25 + $0x60] sm:$0xff]  ;;  %v186_v20 = vld [vmem:[%s511_s25 + $0x58] sm:$0xff] }
  0x14   : > { %254 = vmatpush1.msra.mxu0 %v197_v9  ;;  %428 = vmatpush1.msra.mxu1 %v197_v9  ;;  %v185_v21 = vld [vmem:[%s511_s25 + $0x50] sm:$0xff]  ;;  %v184_v22 = vld [vmem:[%s511_s25 + $0x48] sm:$0xff]  ;;  %v183_v23 = vld [vmem:[%s511_s25 + $0x40] sm:$0xff] }
  0x15   : > { %255 = vmatprep.subr.mxu0 %v196_v10  ;;  %416 = vmatprep.subr.mxu1 %v196_v10  ;;  %v182_v24 = vld [vmem:[%s511_s25 + $0x38] sm:$0xff]  ;;  %v181_v25 = vld [vmem:[%s511_s25 + $0x30] sm:$0xff]  ;;  %v180_v26 = vld [vmem:[%s511_s25 + $0x28] sm:$0xff] }
  0x16   : > { %256 = vmatpush1.msra.mxu0 %v195_v11  ;;  %429 = vmatpush1.msra.mxu1 %v195_v11  ;;  %v179_v27 = vld [vmem:[%s511_s25 + $0x20] sm:$0xff]  ;;  %v178_v28 = vld [vmem:[%s511_s25 + $0x18] sm:$0xff]  ;;  %v177_v29 = vld [vmem:[%s511_s25 + $0x10] sm:$0xff] }
  0x17   : > { %257 = vmatprep.subr.mxu0 %v194_v12  ;;  %417 = vmatprep.subr.mxu1 %v194_v12  ;;  %v176_v30 = vld [vmem:[%s511_s25 + $0x8] sm:$0xff]  ;;  %v175_v31 = vld [vmem:[%s511_s25] sm:$0xff] }
  0x18   : > { %258 = vmatpush1.msra.mxu0 %v193_v13  ;;  %430 = vmatpush1.msra.mxu1 %v193_v13 }
  0x19   : > { %259 = vmatprep.subr.mxu0 %v192_v14  ;;  %418 = vmatprep.subr.mxu1 %v192_v14 }
  0x1a   : > { %260 = vmatpush1.msra.mxu0 %v191_v15  ;;  %431 = vmatpush1.msra.mxu1 %v191_v15 }
  0x1b   : > { %261 = vmatprep.subr.mxu0 %v190_v16  ;;  %419 = vmatprep.subr.mxu1 %v190_v16 }
  0x1c   : > { %262 = vmatpush1.msra.mxu0 %v189_v17  ;;  %432 = vmatpush1.msra.mxu1 %v189_v17 }
  0x1d   : > { %263 = vmatprep.subr.mxu0 %v188_v18  ;;  %420 = vmatprep.subr.mxu1 %v188_v18 }
  0x1e   : > { %264 = vmatpush1.msra.mxu0 %v187_v19  ;;  %433 = vmatpush1.msra.mxu1 %v187_v19 }
  0x1f   : > { %265 = vmatprep.subr.mxu0 %v186_v20  ;;  %421 = vmatprep.subr.mxu1 %v186_v20 }
  0x20   : > { %266 = vmatpush1.msra.mxu0 %v185_v21  ;;  %434 = vmatpush1.msra.mxu1 %v185_v21 }
  0x21   : > { %267 = vmatprep.subr.mxu0 %v184_v22  ;;  %422 = vmatprep.subr.mxu1 %v184_v22 }
  0x22   : > { %268 = vmatpush1.msra.mxu0 %v183_v23  ;;  %435 = vmatpush1.msra.mxu1 %v183_v23 }
  0x23   : > { %269 = vmatprep.subr.mxu0 %v182_v24  ;;  %423 = vmatprep.subr.mxu1 %v182_v24 }
  0x24   : > { %270 = vmatpush1.msra.mxu0 %v181_v25  ;;  %436 = vmatpush1.msra.mxu1 %v181_v25 }
  0x25   : > { %271 = vmatprep.subr.mxu0 %v180_v26  ;;  %424 = vmatprep.subr.mxu1 %v180_v26 }
  0x26   : > { %272 = vmatpush1.msra.mxu0 %v179_v27  ;;  %437 = vmatpush1.msra.mxu1 %v179_v27 }
  0x27   : > { %273 = vmatprep.subr.mxu0 %v178_v28  ;;  %425 = vmatprep.subr.mxu1 %v178_v28 }
  0x28   : > { %274 = vmatpush1.msra.mxu0 %v177_v29  ;;  %438 = vmatpush1.msra.mxu1 %v177_v29 }
  0x29   : > { %275 = vmatprep.subr.mxu0 %v176_v30  ;;  %426 = vmatprep.subr.mxu1 %v176_v30 }
  0x2a   : > { %276 = vmatpush1.msra.mxu0 %v175_v31  ;;  %439 = vmatpush1.msra.mxu1 %v175_v31 }
  0x2b   : > { %407 = vmatmul.mubr.msk.f32.vlgmr.msra.gmra.mxu0 %vm225_vm1, %v171_v32  ;;  %409 = vmatmul.mubr.msk.f32.vlgmr.msra.gmra.mxu1 %vm225_vm1, %v173_v33 }
  0x2c   : > { %315 = vmatprep.mubr.f32.mxu0 %v461_v0  ;;  %327 = vmatprep.mubr.f32.mxu1 %v461_v0 }
  0x2f   : > { %408 = vmatmul.mubr.msk.f32.gmra.mxu0 %vm225_vm1, %v172_v34  ;;  %410 = vmatmul.mubr.msk.f32.gmra.mxu1 %vm225_vm1, %v174_v35 }
  0x89   : > { %v218_v36 = vpop.permute.xlu1 %217  ;;  %v208_v37 = vpop.permute.xlu0 %207 }
  0x8d   : > { %v223_v44 = vpop.permute.xlu1 %222  ;;  %v213_v45 = vpop.permute.xlu0 %212 }
  0xeb   : > { %v311_v38 = vpop.f32.mrf.mxu0  ;;  %v323_v39 = vpop.f32.mrf.mxu1 }
  0xec   : > { %v312_v40 = vadd.f32 %v311_v38, %v208_v37  ;;  %v324_v41 = vadd.f32 %v323_v39, %v218_v36 }
  0xed   : > { %v313_v42 = vpop.f32.mrf.mxu0  ;;  %v325_v43 = vpop.f32.mrf.mxu1 }
  0xee   : > { %334 = vst [vmem:[%s170_s10] sm:$0xff] %v312_v40  ;;  %338 = vst [vmem:[%s170_s10 + $0x20] sm:$0xff] %v324_v41  ;;  %v314_v46 = vadd.f32 %v313_v42, %v208_v37  ;;  %v326_v47 = vadd.f32 %v325_v43, %v218_v36 }
  0xef   : > { %v317_v48 = vpop.f32.mrf.mxu0  ;;  %v329_v49 = vpop.f32.mrf.mxu1 }
  0xf0   : > { %335 = vst [vmem:[%s170_s10 + $0x8] sm:$0xff] %v314_v46  ;;  %339 = vst [vmem:[%s170_s10 + $0x28] sm:$0xff] %v326_v47  ;;  %v318_v50 = vadd.f32 %v317_v48, %v213_v45  ;;  %v330_v51 = vadd.f32 %v329_v49, %v223_v44 }
  0xf1   : > { %v319_v52 = vpop.f32.mrf.mxu0  ;;  %v331_v53 = vpop.f32.mrf.mxu1 }
  0xf2   : > { %336 = vst [vmem:[%s170_s10 + $0x10] sm:$0xff] %v318_v50  ;;  %340 = vst [vmem:[%s170_s10 + $0x30] sm:$0x3f] %v330_v51  ;;  %v320_v54 = vadd.f32 %v319_v52, %v213_v45  ;;  %v332_v55 = vadd.f32 %v331_v53, %v223_v44 }
  0xf4   : > { %337 = vst [vmem:[%s170_s10 + $0x18] sm:$0xff] %v320_v54  ;;  %341 = vst [vmem:[%s170_s10 + $0x38] sm:$0x3f] %v332_v55 }
  0xf5 PF: > { %s13_s12 = sadd.s32 1, %s459_s12  }
  0xf6   : > { %p10_p4 = scmp.ge.s32.totalorder %s13_s12, 4  }
  0xf8   :  { %12 = sbr.rel (!%p10_p4) target bundleno = 1 (0x1), region = 62 }

</bundles_post_ra>
